<compile_context>
chip_gen: v5e
topology: v5e:2x2
jax: 0.10.0
libtpu: 0.0.40
codegen_flags: <defaults>
</compile_context>

<pallas_src>
import jax
import jax.numpy as jnp
from jax.experimental import pallas as pl
from jax.experimental.pallas import tpu as pltpu


def _identity_kernel(x_hbm, o_hbm):
    # No-op body: the output is aliased to the input via input_output_aliases,
    # so there is nothing to compute and nothing to copy.
    del x_hbm, o_hbm


def identity_pallas(x: jax.Array) -> jax.Array:
    """Pallas 'kernel' for nn.Identity: output buffer is aliased to the input.

    Zero bytes of HBM traffic are issued by the kernel itself.
    """
    return pl.pallas_call(
        _identity_kernel,
        out_shape=jax.ShapeDtypeStruct(x.shape, x.dtype),
        in_specs=[pl.BlockSpec(memory_space=pl.ANY)],   # raw HBM ref, no auto-DMA
        out_specs=pl.BlockSpec(memory_space=pl.ANY),    # raw HBM ref, no auto-DMA
        input_output_aliases={0: 0},                    # output *is* the input buffer
        cost_estimate=pl.CostEstimate(flops=0, transcendentals=0, bytes_accessed=0),
    )(x)


def identity(x: jax.Array) -> jax.Array:
    """Fastest path for nn.Identity: a pure no-op, no kernel launch at all."""
    return x


if __name__ == "__main__":
    key = jax.random.PRNGKey(0)
    # NCHW input, small shape: batch=2, channels=4, spatial=16x16
    x = jax.random.normal(key, (2, 4, 16, 16), dtype=jnp.float32)

    # Exercise the Pallas (aliased, zero-copy) kernel path once.
    y = identity_pallas(x)
    jax.block_until_ready(y)

    assert y.shape == x.shape and y.dtype == x.dtype
    assert bool(jnp.all(y == x))

    # Also sanity-check the free wrapper-level path.
    z = identity(x)
    assert z is x

    print("KERNEL_OK")
</pallas_src>

<mosaic_0001>
module attributes {stable_mosaic.version = 11 : i64} {
  func.func @_identity_kernel(%arg0: memref<2x4x16x16xf32, #tpu.memory_space<any>>, %arg1: memref<2x4x16x16xf32, #tpu.memory_space<any>>) attributes {dimension_semantics = [], scalar_prefetch = 0 : i64, scratch_operands = 0 : i64, tpu.core_type = #tpu.core_type<tc>} {
    return
  }
}

</mosaic_0001>

<bundles_post_ra>
// kernel: tpu_custom_call.1
= control target key start
LH: loop header
LB: loop body
LE: loop exit
PB: predicated region body
PF: predicated region fallthrough
CT: control target
= control target key end

     0   :  { %s16_s0 = inlined_call_operand.hbm [shape: f32[2,4,16,16], index: 0, kind: input, shape index: {}, may-alias: {0,1}]   ;;  %s17_s1 = inlined_call_operand.hbm [shape: f32[2,4,16,16], index: 1, kind: output, shape index: {}, may-alias: {0,1}]  }

</bundles_post_ra>
